<compile_context>
chip_gen: v7x
topology: tpu7x:2x2x1
jax: 0.10.0
libtpu: 0.0.40
codegen_flags: <defaults>
</compile_context>

<pallas_src>
import functools

import jax
import jax.numpy as jnp
import numpy as np
from jax.experimental import pallas as pl
from jax.experimental.pallas import tpu as pltpu

_BN_EPS = 1e-5
_LANES = 128
_SUBLANES = 8
_ROW_TILE_CAP = 2048                 # per-step rows: big enough to amortize
_VMEM_BUDGET = 24 * 1024 * 1024      # conservative: fits v7x 64 MiB physical
_VMEM_LIMIT = 32 * 1024 * 1024       # scoped-VMEM limit for the pallas_calls


def _round_up(x, m):
    return ((x + m - 1) // m) * m


def _conv_relu_stats_kernel(p_ref, w_ref, b_ref, y_ref, stats_ref, *,
                            total_rows, row_tile):
    """Phase 1: im2col matmul (bf16 MXU, f32 acc) + bias + ReLU + partial stats.

    p_ref     : (TR, Kc)     bf16 im2col patches for this row tile
    w_ref     : (Kc, COp)    bf16 weights (flattened taps x padded channels)
    b_ref     : (1, COp)     f32 conv bias (zero-padded channels)
    y_ref     : (TR, COp)    bf16 conv+ReLU output (lane-dense)
    stats_ref : (1, 2, COp)  f32 partial stats: row0 = sum, row1 = sum(x^2)
    """
    acc = jnp.dot(p_ref[...], w_ref[...], preferred_element_type=jnp.float32)
    acc = jnp.maximum(acc + b_ref[...], 0.0)
    y_ref[...] = acc.astype(y_ref.dtype)

    # Mask padded rows (rows >= total_rows) out of the BN moments.
    rows = (pl.program_id(0) * row_tile
            + jax.lax.broadcasted_iota(jnp.int32, (row_tile, 1), 0))
    masked = jnp.where(rows < total_rows, acc, 0.0)
    s1 = jnp.sum(masked, axis=0, keepdims=True)
    s2 = jnp.sum(masked * masked, axis=0, keepdims=True)
    stats_ref[0] = jnp.concatenate([s1, s2], axis=0)


def _bn_relayout_kernel(y_ref, scale_ref, shift_ref, o_ref):
    """Phase 2 (fused): y*scale + shift, transpose to (Cout, spatial) NCHW slab.

    y_ref     : (SP, COp)   bf16 conv+ReLU rows for one image's spatial tile
    scale_ref : (1, COp)    f32 folded BN scale  (gamma / sqrt(var+eps))
    shift_ref : (1, COp)    f32 folded BN shift  (beta - mean*scale)
    o_ref     : (Cout, SP)  output slab: channels on sublanes, spatial on lanes
    """
    y = y_ref[...].astype(jnp.float32) * scale_ref[...] + shift_ref[...]
    cout = o_ref.shape[0]
    # Transpose the full aligned (SP, COp) tile (XLU), then take the Cout
    # useful sublanes -- keeps both transpose dims (8,128)-aligned.
    o_ref[...] = jnp.transpose(y)[:cout, :].astype(o_ref.dtype)


def _bn_apply_kernel(y_ref, scale_ref, shift_ref, o_ref):
    """Phase 2 (fallback): lane-dense y*scale + shift."""
    o_ref[...] = (y_ref[...].astype(jnp.float32) * scale_ref[...]
                  + shift_ref[...]).astype(o_ref.dtype)


def custom_conv2d_forward(x_nchw, w_oihw, bias, gamma, beta, *, pad=1):
    """Forward pass of CustomConv2d(default args). Input/output are NCHW."""
    N, Cin, H, W = x_nchw.shape
    Cout, Cin_w, KH, KW = w_oihw.shape
    assert Cin == Cin_w
    Ho = H + 2 * pad - KH + 1
    Wo = W + 2 * pad - KW + 1
    HoWo = Ho * Wo
    R = N * HoWo                                   # total output rows
    Kc = KH * KW * Cin                             # contraction dim (unpadded)
    COp = _round_up(Cout, _LANES)                  # lane-dense channel dim

    # --- Row tile: fixed size, VMEM-budget-capped, decoupled from the image.
    # Per-step working set ~ 2 x TR x (Kc*2 + COp*2) bytes (double-buffered
    # bf16 patches + bf16 y) plus the resident Kc x COp bf16 weights.
    per_row_bytes = 2 * (Kc * 2 + COp * 2)
    vmem_cap = max(_SUBLANES,
                   (_VMEM_BUDGET // per_row_bytes) // _SUBLANES * _SUBLANES)
    TR = min(_ROW_TILE_CAP, vmem_cap,
             _round_up(pl.cdiv(R, 2), _SUBLANES))  # >=2 tiles for megacore
    TR = max(TR, _SUBLANES)
    R_pad = _round_up(R, TR)
    n_tiles = R_pad // TR

    # ---- XLA glue: NCHW -> padded NHWC -> im2col patch matrix (bf16) ----
    x = jnp.transpose(x_nchw, (0, 2, 3, 1))
    x = jnp.pad(x, ((0, 0), (pad, pad), (pad, pad), (0, 0)))
    taps = [x[:, kh:kh + Ho, kw:kw + Wo, :]
            for kh in range(KH) for kw in range(KW)]        # (kh, kw, cin)
    patches = jnp.concatenate(taps, axis=-1).reshape(R, Kc)
    patches = jnp.pad(patches, ((0, R_pad - R), (0, 0))).astype(jnp.bfloat16)

    # OIHW -> (KH*KW*Cin, Cout), channel-lane zero-padded, bf16.
    w2d = jnp.transpose(w_oihw, (2, 3, 1, 0)).reshape(Kc, Cout)
    w2d = jnp.pad(w2d, ((0, 0), (0, COp - Cout))).astype(jnp.bfloat16)

    b_p = jnp.pad(bias.astype(jnp.float32), (0, COp - Cout)).reshape(1, COp)
    g_p = jnp.pad(gamma.astype(jnp.float32), (0, COp - Cout)).reshape(1, COp)
    beta_p = jnp.pad(beta.astype(jnp.float32), (0, COp - Cout)).reshape(1, COp)

    cost = pl.CostEstimate(
        flops=2 * R_pad * Kc * COp,
        transcendentals=0,
        bytes_accessed=(R_pad * Kc * 2 + Kc * COp * 2
                        + R_pad * COp * 2 + n_tiles * 2 * COp * 4))

    # ---- Phase 1: conv + bias + ReLU + per-tile BN moments ----
    kern1 = functools.partial(_conv_relu_stats_kernel,
                              total_rows=R, row_tile=TR)
    y, stats = pl.pallas_call(
        kern1,
        out_shape=(jax.ShapeDtypeStruct((R_pad, COp), jnp.bfloat16),
                   jax.ShapeDtypeStruct((n_tiles, 2, COp), jnp.float32)),
        grid_spec=pltpu.PrefetchScalarGridSpec(
            num_scalar_prefetch=0,
            grid=(n_tiles,),
            in_specs=[
                pl.BlockSpec((TR, Kc), lambda i: (i, 0)),
                pl.BlockSpec((Kc, COp), lambda i: (0, 0)),
                pl.BlockSpec((1, COp), lambda i: (0, 0)),
            ],
            out_specs=[
                pl.BlockSpec((TR, COp), lambda i: (i, 0)),
                pl.BlockSpec((1, 2, COp), lambda i: (i, 0, 0)),
            ]),
        compiler_params=pltpu.CompilerParams(
            dimension_semantics=("parallel",),
            vmem_limit_bytes=_VMEM_LIMIT),
        cost_estimate=cost,
    )(patches, w2d, b_p)

    # ---- Fold global batch stats into per-channel scale/shift (tiny, XLA) ----
    s1 = jnp.sum(stats[:, 0, :], axis=0)
    s2 = jnp.sum(stats[:, 1, :], axis=0)
    mean = s1 / R
    var = jnp.maximum(s2 / R - mean * mean, 0.0)          # biased variance
    inv = jax.lax.rsqrt(var + _BN_EPS)
    scale = (g_p[0] * inv).reshape(1, COp)
    shift = (beta_p[0] - mean * g_p[0] * inv).reshape(1, COp)

    fused_relayout = (HoWo % _LANES == 0) and (Cout % _SUBLANES == 0)

    if fused_relayout:
        # ---- Phase 2 (fused): normalize + write NCHW slab (N*Cout, Ho*Wo) ----
        sp_start = (min(HoWo, _ROW_TILE_CAP) // _LANES) * _LANES
        SP = next(c for c in range(sp_start, 0, -_LANES) if HoWo % c == 0)
        n_sp = HoWo // SP
        out2d = pl.pallas_call(
            _bn_relayout_kernel,
            out_shape=jax.ShapeDtypeStruct((N * Cout, HoWo), x_nchw.dtype),
            grid_spec=pltpu.PrefetchScalarGridSpec(
                num_scalar_prefetch=0,
                grid=(N, n_sp),
                in_specs=[
                    pl.BlockSpec((SP, COp), lambda n, s: (n * n_sp + s, 0)),
                    pl.BlockSpec((1, COp), lambda n, s: (0, 0)),
                    pl.BlockSpec((1, COp), lambda n, s: (0, 0)),
                ],
                out_specs=pl.BlockSpec((Cout, SP), lambda n, s: (n, s))),
            compiler_params=pltpu.CompilerParams(
                dimension_semantics=("parallel", "parallel"),
                vmem_limit_bytes=_VMEM_LIMIT),
        )(y, scale, shift)
        return out2d.reshape(N, Cout, Ho, Wo)

    # ---- Phase 2 (fallback): lane-dense normalize, relayout in XLA ----
    y_norm = pl.pallas_call(
        _bn_apply_kernel,
        out_shape=jax.ShapeDtypeStruct((R_pad, COp), x_nchw.dtype),
        grid_spec=pltpu.PrefetchScalarGridSpec(
            num_scalar_prefetch=0,
            grid=(n_tiles,),
            in_specs=[
                pl.BlockSpec((TR, COp), lambda i: (i, 0)),
                pl.BlockSpec((1, COp), lambda i: (0, 0)),
                pl.BlockSpec((1, COp), lambda i: (0, 0)),
            ],
            out_specs=pl.BlockSpec((TR, COp), lambda i: (i, 0))),
        compiler_params=pltpu.CompilerParams(
            dimension_semantics=("parallel",),
            vmem_limit_bytes=_VMEM_LIMIT),
    )(y, scale, shift)
    out = y_norm[:R, :Cout].reshape(N, Ho, Wo, Cout)
    return jnp.transpose(out, (0, 3, 1, 2))


def _reference_forward(x_nchw, w_oihw, bias, gamma, beta, *, pad=1,
                       mimic_kernel=False):
    """Pure-JAX reference (PyTorch semantics).  With mimic_kernel=True the
    conv operands are bf16-rounded and the conv+ReLU activation is rounded to
    bf16 before normalization (stats stay f32), mirroring the kernel's bf16
    MXU operands, f32 accumulation and bf16 intermediate store."""
    if mimic_kernel:
        cast = lambda a: a.astype(jnp.bfloat16).astype(jnp.float32)
    else:
        cast = lambda a: a.astype(jnp.float32)
    y = jax.lax.conv_general_dilated(
        cast(x_nchw), cast(w_oihw), window_strides=(1, 1),
        padding=[(pad, pad), (pad, pad)],
        dimension_numbers=("NCHW", "OIHW", "NCHW"),
        precision=jax.lax.Precision.HIGHEST)
    y = jnp.maximum(y + bias.reshape(1, -1, 1, 1), 0.0)
    mean = jnp.mean(y, axis=(0, 2, 3), keepdims=True)
    var = jnp.mean((y - mean) ** 2, axis=(0, 2, 3), keepdims=True)
    y_n = cast(y) if mimic_kernel else y
    out = (y_n - mean) * jax.lax.rsqrt(var + _BN_EPS)
    return out * gamma.reshape(1, -1, 1, 1) + beta.reshape(1, -1, 1, 1)


if __name__ == "__main__":
    # Small, deterministic problem: CustomConv2d(4, 8, kernel_size=3, pad=1)
    N, Cin, H, W = 2, 4, 16, 16
    Cout, K = 8, 3

    key = jax.random.PRNGKey(0)
    kx, kw, kb, kg, kbeta = jax.random.split(key, 5)
    x = jax.random.normal(kx, (N, Cin, H, W), jnp.float32)
    w = jax.random.normal(kw, (Cout, Cin, K, K), jnp.float32) * 0.1
    b = jax.random.normal(kb, (Cout,), jnp.float32) * 0.1
    gamma = 1.0 + 0.1 * jax.random.normal(kg, (Cout,), jnp.float32)
    beta = 0.1 * jax.random.normal(kbeta, (Cout,), jnp.float32)

    out = jax.block_until_ready(
        custom_conv2d_forward(x, w, b, gamma, beta, pad=1))

    # Tight check against a reference that mirrors the kernel's numerics
    # (bf16 MXU operands, f32 accumulate, bf16 intermediate activation).
    ref_mimic = _reference_forward(x, w, b, gamma, beta, pad=1,
                                   mimic_kernel=True)
    np.testing.assert_allclose(np.asarray(out), np.asarray(ref_mimic),
                               rtol=2e-3, atol=2e-3)

    # Loose fidelity check against the full-f32 PyTorch-equivalent reference.
    ref_f32 = _reference_forward(x, w, b, gamma, beta, pad=1)
    np.testing.assert_allclose(np.asarray(out), np.asarray(ref_f32),
                               rtol=0.1, atol=0.1)

    print("KERNEL_OK")
</pallas_src>

<mosaic_0001>
module attributes {stable_mosaic.version = 11 : i64} {
  func.func @_conv_relu_stats_kernel(%arg0: i32, %arg1: memref<256x36xbf16, #tpu.memory_space<vmem>>, %arg2: memref<36x128xbf16, #tpu.memory_space<vmem>>, %arg3: memref<1x128xf32, #tpu.memory_space<vmem>>, %arg4: memref<256x128xbf16, #tpu.memory_space<vmem>>, %arg5: memref<1x2x128xf32, #tpu.memory_space<vmem>>) attributes {dimension_semantics = [#tpu.dimension_semantics<parallel>], iteration_bounds = array<i64: 2>, scalar_prefetch = 0 : i64, scratch_operands = 0 : i64, tpu.core_type = #tpu.core_type<tc>, window_params = [{transform_indices = @transform_0, window_bounds = array<i64: 256, 36>}, {pipeline_mode = #tpu.pipeline_mode<synchronous>, transform_indices = @transform_1, window_bounds = array<i64: 36, 128>}, {pipeline_mode = #tpu.pipeline_mode<synchronous>, transform_indices = @transform_2, window_bounds = array<i64: 1, 128>}, {transform_indices = @transform_3, window_bounds = array<i64: 256, 128>}, {transform_indices = @transform_4, window_bounds = array<i64: 1, 2, 128>}]} {
    %c0 = arith.constant 0 : index
    %c0_0 = arith.constant 0 : index
    %0 = vector.load %arg1[%c0, %c0_0] : memref<256x36xbf16, #tpu.memory_space<vmem>>, vector<256x36xbf16>
    %c0_1 = arith.constant 0 : index
    %c0_2 = arith.constant 0 : index
    %1 = vector.load %arg2[%c0_1, %c0_2] : memref<36x128xbf16, #tpu.memory_space<vmem>>, vector<36x128xbf16>
    %cst = arith.constant dense<0.000000e+00> : vector<256x128xf32>
    %2 = tpu.matmul %0, %1, %cst {dimension_numbers = #tpu.dot_dimension_numbers<[1], [0], [0], [1], [0, 0, 1, 1], [], []>} : vector<256x36xbf16>, vector<36x128xbf16>, vector<256x128xf32> -> vector<256x128xf32>
    %c0_3 = arith.constant 0 : index
    %c0_4 = arith.constant 0 : index
    %3 = vector.load %arg3[%c0_3, %c0_4] : memref<1x128xf32, #tpu.memory_space<vmem>>, vector<1x128xf32>
    %4 = vector.broadcast %3 : vector<1x128xf32> to vector<256x128xf32>
    %5 = arith.addf %2, %4 : vector<256x128xf32>
    %cst_5 = arith.constant 0.000000e+00 : f32
    %6 = vector.broadcast %cst_5 : f32 to vector<256x128xf32>
    %7 = arith.maximumf %5, %6 : vector<256x128xf32>
    %8 = arith.truncf %7 : vector<256x128xf32> to vector<256x128xbf16>
    %c0_6 = arith.constant 0 : index
    %c0_7 = arith.constant 0 : index
    %9 = vector.load %arg4[%c0_6, %c0_7] : memref<256x128xbf16, #tpu.memory_space<vmem>>, vector<256x128xbf16>
    tpu.vector_store %arg4[%c0_6, %c0_7], %8 {strides = array<i32>} : memref<256x128xbf16, #tpu.memory_space<vmem>>, vector<256x128xbf16>,
    %c256_i32 = arith.constant 256 : i32
    %10 = arith.muli %arg0, %c256_i32 : i32
    %11 = tpu.iota {dimensions = array<i32: 0>} : vector<256x1xi32>
    %12 = vector.broadcast %10 : i32 to vector<256x1xi32>
    %13 = arith.addi %12, %11 : vector<256x1xi32>
    %c512_i32 = arith.constant 512 : i32
    %14 = vector.broadcast %c512_i32 : i32 to vector<256x1xi32>
    %15 = arith.cmpi slt, %13, %14 : vector<256x1xi32>
    %cst_8 = arith.constant 0.000000e+00 : f32
    %16 = vector.shape_cast %15 : vector<256x1xi1> to vector<256x1xi1>
    %17 = vector.broadcast %16 : vector<256x1xi1> to vector<256x128xi1>
    %18 = vector.broadcast %cst_8 : f32 to vector<256x128xf32>
    %19 = arith.select %17, %7, %18 : vector<256x128xi1>, vector<256x128xf32>
    %cst_9 = arith.constant dense<0.000000e+00> : vector<128xf32>
    %20 = vector.multi_reduction <add>, %19, %cst_9 [0] : vector<256x128xf32> to vector<128xf32>
    %21 = vector.shape_cast %20 : vector<128xf32> to vector<1x128xf32>
    %22 = arith.mulf %19, %19 : vector<256x128xf32>
    %cst_10 = arith.constant dense<0.000000e+00> : vector<128xf32>
    %23 = vector.multi_reduction <add>, %22, %cst_10 [0] : vector<256x128xf32> to vector<128xf32>
    %24 = vector.shape_cast %23 : vector<128xf32> to vector<1x128xf32>
    %25 = tpu.concatenate %21, %24 in 0 : vector<1x128xf32>, vector<1x128xf32> -> vector<2x128xf32>
    %c0_11 = arith.constant 0 : index
    %c0_12 = arith.constant 0 : index
    %c0_13 = arith.constant 0 : index
    %26 = vector.load %arg5[%c0_11, %c0_12, %c0_13] : memref<1x2x128xf32, #tpu.memory_space<vmem>>, vector<1x2x128xf32>
    %27 = vector.shape_cast %26 : vector<1x2x128xf32> to vector<2x128xf32>
    %28 = vector.shape_cast %25 : vector<2x128xf32> to vector<1x2x128xf32>
    tpu.vector_store %arg5[%c0_11, %c0_12, %c0_13], %28 {strides = array<i32>} : memref<1x2x128xf32, #tpu.memory_space<vmem>>, vector<1x2x128xf32>,
    return
  }
  func.func @transform_0(%arg0: i32) -> (i32, i32) {
    %c0_i32 = arith.constant 0 : i32
    %c0_i32_0 = arith.constant 0 : i32
    return %arg0, %c0_i32 : i32, i32
  }
  func.func @transform_1(%arg0: i32) -> (i32, i32) {
    %c0_i32 = arith.constant 0 : i32
    %c0_i32_0 = arith.constant 0 : i32
    %c0_i32_1 = arith.constant 0 : i32
    return %c0_i32, %c0_i32_0 : i32, i32
  }
  func.func @transform_2(%arg0: i32) -> (i32, i32) {
    %c0_i32 = arith.constant 0 : i32
    %c0_i32_0 = arith.constant 0 : i32
    %c0_i32_1 = arith.constant 0 : i32
    return %c0_i32, %c0_i32_0 : i32, i32
  }
  func.func @transform_3(%arg0: i32) -> (i32, i32) {
    %c0_i32 = arith.constant 0 : i32
    %c0_i32_0 = arith.constant 0 : i32
    return %arg0, %c0_i32 : i32, i32
  }
  func.func @transform_4(%arg0: i32) -> (i32, i32, i32) {
    %c0_i32 = arith.constant 0 : i32
    %c0_i32_0 = arith.constant 0 : i32
    %c0_i32_1 = arith.constant 0 : i32
    return %arg0, %c0_i32, %c0_i32_0 : i32, i32, i32
  }
}

</mosaic_0001>

<bundles_post_ra>
// kernel: tpu_custom_call.1
= control target key start
LH: loop header
LB: loop body
LE: loop exit
PB: predicated region body
PF: predicated region fallthrough
CT: control target
= control target key end

     0   :  { %10 = vsyncpa [#allocation3], 0  ;;  %s2228_s0 = inlined_call_operand.vmem [shape: bf16[512,36], index: 0, kind: input, shape index: {}]   ;;  %s2229_s1 = inlined_call_operand.vmem [shape: bf16[36,128], index: 1, kind: input, shape index: {}]   ;;  %s2230_s2 = inlined_call_operand.vmem [shape: f32[1,128], index: 2, kind: input, shape index: {}]   ;;  %s2231_s3 = inlined_call_operand.hbm [shape: bf16[512,128], index: 3, kind: output, shape index: {0}]   ;;  %s2232_s4 = inlined_call_operand.hbm [shape: f32[2,2,128], index: 4, kind: output, shape index: {1}]  }
   0x1   :  { %12 = vsyncpa [#allocation3 + $0x1], 0 }
   0x2   :  { %13 = vsyncpa [#allocation5], 0 }
   0x3   :  { %15 = vsyncpa [#allocation5 + $0x1], 0  ;;  %s1653_s15 = smov 0   ;;  %s1655_s16 = smov 0  }
   0x4   :  { %s1657_s17 = smov 0   ;;  %s1659_s18 = smov 0  }
   0x5 LB: > { %s1674_s19 = sadd.s32 4294967295, %s1622_s18   ;;  %s1186_s20 = sadd.s32 4294967294, %s1622_s18   ;;  %s1622_s18 = sphi %s1659_s18, %s2238_s18   ;;  %s1618_s17 = sphi %s1657_s17, %s2237_s17   ;;  %s1614_s16 = sphi %s1655_s16, %s2236_s16   ;;  %s1610_s15 = sphi %s1653_s15, %s2235_s15  }
   0x6   : > { %s1678_s21 = sadd.s32 1, %s1622_s18   ;;  %s96_s22 = sadd.s32 1, %s1618_s17 }
   0x7   : > { %s93_s23 = ssub.s32 %s1622_s18, %s1678_s21  ;;  %p106_p0 = scmp.ne.s32.totalorder %s1618_s17, %s1614_s16 }
   0x8   : > { %p94_p1 = scmp.eq.s32.totalorder %s93_s23, 0  ;;  %p107_p2 = scmp.eq.s32.totalorder %s1674_s19, 1 }
   0x9   : > { %p112_p3 = scmp.ne.s32.totalorder %s1614_s16, %s1610_s15  ;;  %p113_p4 = scmp.eq.s32.totalorder %s1186_s20, 1 }
   0xa   : > { %s1689_s24 = scalar_select %p94_p1, %s1618_s17, %s96_s22  }
   0xb   : > { %p1691_p5 = por %p107_p2, %p106_p0  ;;  %p1695_p6 = por %p113_p4, %p112_p3 }
   0xc   : > { %p1189_p7 = scmp.ge.s32.totalorder %s1622_s18, 1  ;;  %p172_p8 = scmp.lt.s32.totalorder %s1622_s18, 3 }
   0xe   : > { %p173_p9 = pnand %p1189_p7, %p172_p8 }
   0xf   : > { %v1509_v0 = vld [vmem:[%s2229_s1] sm:$0xff] (!%p173_p9)   ;;  %v1510_v1 = vld [vmem:[%s2229_s1 + $0x8] sm:$0xff] (!%p173_p9)   ;;  %s1708_s5 = sshll.u32 (!%p173_p9), %s1674_s19, 5  ;;  %v1511_v2 = vld [vmem:[%s2229_s1 + $0x10] ss:$0 sps:$4 sm:$0x33] (!%p173_p9)   ;;  %v757_v20 = vlaneseq (!%p173_p9) }
  0x10   : > { %176 = sbr.rel (%p173_p9) target bundleno = 352 (0x160), region = 32  ;;  %1417 = vmatprep.subr.bf16.mxu0 (!%p173_p9), %v1509_v0  ;;  %p204_p10 = scmp.lt.s32.totalorder (!%p173_p9), %s1708_s5, 63  ;;  %1455 = vmatprep.subr.bf16.mxu1 (!%p173_p9), %v1509_v0  ;;  %vm399_vm0 = vcmask (!%p173_p9), 1041408   ;;  %vm350_vm1 = vcmask (!%p173_p9), 293888   ;;  %v1784_v39 = vld [vmem:[%s2230_s2] ss:$0 sm:$0xff] (!%p173_p9) }
  0x11   : > { %1418 = vmatpush3.bf16.msra.mxu0 (!%p173_p9), %v1509_v0  ;;  %1458 = vmatpush3.bf16.msra.mxu1 (!%p173_p9), %v1509_v0  ;;  %v401_v3 = vsel (!%p173_p9), %vm399_vm0, %v1511_v2, 0  ;;  %v1752_v21 = vshrl.u32 (!%p173_p9), %v757_v20, 7  ;;  %s1262_s13 = sshll.u32 (!%p173_p9), %s1674_s19, 8  ;;  %s1806_s22 = sand.u32 (!%p173_p9), 1, %s1614_s16  }
  0x12   : > { %1419 = vmatprep.subr.bf16.mxu0 (!%p173_p9), %v1510_v1  ;;  %1456 = vmatprep.subr.bf16.mxu1 (!%p173_p9), %v1510_v1  ;;  %v1756_v23 = vstv (!%p173_p9), %s1262_s13  ;;  %s1190_s23 = sshll.u32 (!%p173_p9), %s1806_s22, 7  ;;  %s1302_s28 = sshll.u32 (!%p173_p9), %s1674_s19, 11 }
  0x13   : > { %v760_v22 = vadd.s32 (!%p173_p9), 16, %v1752_v21  ;;  %v759_v24 = vadd.s32 (!%p173_p9), 8, %v1752_v21  ;;  %v761_v25 = vadd.s32 (!%p173_p9), 24, %v1752_v21  ;;  %v791_v27 = vadd.s32 (!%p173_p9), %v1756_v23, %v1752_v21  ;;  %s1877_s27 = scalar_lea.vmem (!%p173_p9), [#allocation2], %s1190_s23  ;;  %s2115_s6 = scalar_lea.hbm (!%p173_p9), %s2231_s3, %s1302_s28 }
  0x14   : > { %v764_v29 = vadd.s32 (!%p173_p9), 48, %v1752_v21  ;;  %v762_v30 = vadd.s32 (!%p173_p9), 32, %v1752_v21  ;;  %v765_v32 = vadd.s32 (!%p173_p9), 56, %v1752_v21  ;;  %v763_v33 = vadd.s32 (!%p173_p9), 40, %v1752_v21  ;;  %s1079_s29 = sshll.u32 (!%p173_p9), %s1877_s27, 4  ;;  %s1061_s7 = scalar_lea.sflag (!%p173_p9), [#allocation3], %s1806_s22  ;;  %s2117_s29 = int_to_ptr.vmem [resolvable:$true] %s1079_s29 }
  0x15   : > { %1420 = vmatpush3.bf16.msra.mxu0 (!%p173_p9), %v1510_v1  ;;  %1459 = vmatpush3.bf16.msra.mxu1 (!%p173_p9), %v1510_v1  ;;  %v1761_v26 = vadd.s32 (!%p173_p9), %v1756_v23, %v760_v22  ;;  %v1766_v28 = vadd.s32 (!%p173_p9), %v1756_v23, %v759_v24  ;;  %v1771_v31 = vadd.s32 (!%p173_p9), %v1756_v23, %v761_v25  ;;  %v768_v34 = vadd.s32 (!%p173_p9), 80, %v1752_v21 }
  0x16   : > { %1461 = vmatprep.subr.msk.bf16.mxu0 (!%p173_p9), %vm399_vm0, %v1511_v2  ;;  %1462 = vmatprep.subr.msk.bf16.mxu1 (!%p173_p9), %vm399_vm0, %v1511_v2  ;;  %v766_v35 = vadd.s32 (!%p173_p9), 64, %v1752_v21  ;;  %v769_v36 = vadd.s32 (!%p173_p9), 88, %v1752_v21  ;;  %v767_v37 = vadd.s32 (!%p173_p9), 72, %v1752_v21  ;;  %v772_v38 = vadd.s32 (!%p173_p9), 112, %v1752_v21 }
  0x17   : > { %s205_s8 = scalar_select %p204_p10, %s1708_s5, 63  ;;  %vm825_vm2 = vcmp.lt.s32.totalorder %v1761_v26, 512  ;;  %vm823_vm3 = vcmp.lt.s32.totalorder %v791_v27, 512  ;;  %vm824_vm4 = vcmp.lt.s32.totalorder %v1766_v28, 512  ;;  %v1788_v40 = vadd.s32 %v1756_v23, %v764_v29 }
  0x18   : > { %v1791_v41 = vadd.s32 %v1756_v23, %v762_v30  ;;  %v770_v42 = vadd.s32 96, %v1752_v21  ;;  %vm826_vm5 = vcmp.lt.s32.totalorder %v1771_v31, 512  ;;  %v1796_v43 = vadd.s32 %v1756_v23, %v765_v32 }
  0x19   : > { %s1193_s9 = sshll.u32 %s205_s8, 2  ;;  %1422 = vmatpush3.bf16.msra.mxu0 %v401_v3  ;;  %1460 = vmatpush3.bf16.msra.mxu1 %v401_v3  ;;  %v1799_v44 = vadd.s32 %v1756_v23, %v763_v33  ;;  %v1802_v45 = vadd.s32 %v1756_v23, %v768_v34  ;;  %v773_v46 = vadd.s32 120, %v1752_v21  ;;  %v1809_v48 = vadd.s32 %v1756_v23, %v766_v35  ;;  %s1528_s8 = scalar_lea.vmem %s2117_s29, 2048 }
  0x1a   : > { %s1718_s12 = scalar_lea.vmem %s2228_s0, %s1193_s9  ;;  %v1812_v49 = vadd.s32 %v1756_v23, %v769_v36  ;;  %v1815_v50 = vadd.s32 %v1756_v23, %v767_v37  ;;  %v1818_v51 = vadd.s32 %v1756_v23, %v772_v38  ;;  %v771_v54 = vadd.s32 104, %v1752_v21  ;;  %p1529_p11 = scmp.ne.s32.totalorder %s2117_s29, %s1528_s8 }
  0x1b   : > { %v1512_v4 = vld [vmem:[%s1718_s12] sm:$0xff]   ;;  %v1513_v5 = vld [vmem:[%s1718_s12 + $0x8] sm:$0xff]   ;;  %v1514_v6 = vld [vmem:[%s1718_s12 + $0x10] sm:$0xff]   ;;  %v776_v55 = vadd.s32 144, %v1752_v21  ;;  %v774_v56 = vadd.s32 128, %v1752_v21  ;;  %v1826_v59 = vadd.s32 %v1756_v23, %v770_v42  ;;  %v777_v60 = vadd.s32 152, %v1752_v21 }
  0x1c   : > { %1423 = vmatprep.mubr.msk.bf16.mxu0 %vm350_vm1, %v1512_v4  ;;  %v1515_v7 = vld [vmem:[%s1718_s12 + $0x18] sm:$0xff]   ;;  %v1520_v8 = vld [vmem:[%s1718_s12 + $0x40] sm:$0xff]   ;;  %v1521_v9 = vld [vmem:[%s1718_s12 + $0x48] sm:$0xff]   ;;  %v775_v61 = vadd.s32 136, %v1752_v21  ;;  %vm827_vm6 = vcmp.lt.s32.totalorder %v1791_v41, 512  ;;  %v1834_v1 = vadd.s32 %v1756_v23, %v773_v46  ;;  %v780_v2 = vadd.s32 176, %v1752_v21  ;;  %p1530_p12 = pnand %p1529_p11, %p1691_p5 }
  0x1d   : > { %1424 = vmatmul.mubr.msk.bf16.vlgmr.msra.gmra.mrb[0].mxu0 %vm350_vm1, %v1513_v5  ;;  %1439 = vmatprep.mubr.msk.bf16.mxu1 %vm350_vm1, %v1520_v8  ;;  %v1522_v10 = vld [vmem:[%s1718_s12 + $0x50] sm:$0xff]   ;;  %v1516_v11 = vld [vmem:[%s1718_s12 + $0x20] sm:$0xff]   ;;  %v1523_v12 = vld [vmem:[%s1718_s12 + $0x58] sm:$0xff]   ;;  %v778_v5 = vadd.s32 160, %v1752_v21  ;;  %vm829_vm7 = vcmp.lt.s32.totalorder %v1788_v40, 512  ;;  %vm828_vm8 = vcmp.lt.s32.totalorder %v1799_v44, 512  ;;  %v1843_v8 = vadd.s32 %v1756_v23, %v771_v54 }
  0x1e   : > { %1427 = vmatprep.mubr.msk.bf16.mxu0 %vm350_vm1, %v1514_v6  ;;  %1440 = vmatmul.mubr.msk.bf16.vlgmr.msra.gmra.mrb[0].mxu1 %vm350_vm1, %v1521_v9  ;;  %v1524_v13 = vld [vmem:[%s1718_s12 + $0x60] sm:$0xff]   ;;  %v1517_v14 = vld [vmem:[%s1718_s12 + $0x28] sm:$0xff]   ;;  %v1518_v15 = vld [vmem:[%s1718_s12 + $0x30] sm:$0xff]   ;;  %v781_v6 = vadd.s32 184, %v1752_v21  ;;  %vm830_vm9 = vcmp.lt.s32.totalorder %v1796_v43, 512  ;;  %v1862_v20 = vadd.s32 %v1756_v23, %v780_v2  ;;  %v1865_v22 = vadd.s32 168, %v1752_v21  ;;  %p1531_p13 = pneg %p1530_p12 }
  0x1f   : > { %1443 = vmatprep.mubr.msk.bf16.mxu1 %vm350_vm1, %v1522_v10  ;;  %v1525_v16 = vld [vmem:[%s1718_s12 + $0x68] sm:$0xff]   ;;  %v1526_v17 = vld [vmem:[%s1718_s12 + $0x70] sm:$0xff]   ;;  %v1519_v18 = vld [vmem:[%s1718_s12 + $0x38] sm:$0xff]   ;;  %v1846_v10 = vadd.s32 %v1756_v23, %v776_v55  ;;  %v1870_v30 = vadd.s32 %v1756_v23, %v778_v5  ;;  %vm831_vm10 = vcmp.lt.s32.totalorder %v1809_v48, 512  ;;  %vm833_vm11 = vcmp.lt.s32.totalorder %v1802_v45, 512  ;;  %s1624_s9 = smov [#allocation2]  }
  0x20   : > { %v1527_v19 = vld [vmem:[%s1718_s12 + $0x78] sm:$0xff]   ;;  %v1873_v26 = vadd.s32 %v1756_v23, %v781_v6  ;;  %vm832_vm12 = vcmp.lt.s32.totalorder %v1815_v50, 512  ;;  %vm834_vm13 = vcmp.lt.s32.totalorder %v1812_v49, 512  ;;  %vm835_vm14 = vcmp.lt.s32.totalorder %v1826_v59, 512  ;;  %s1532_s10 = sshll.u32 %s1624_s9, 4  ;;  %s1533_s10 = int_to_ptr.vmem [resolvable:$false] %s1532_s10 }
  0x21   : > { %vm837_vm0 = vcmp.lt.s32.totalorder %v1818_v51, 512  ;;  %s1534_s11 = scalar_lea.vmem %s1533_s10, 4096  ;;  %p1535_p0 = scmp.lt.s32.totalorder %s2117_s29, %s1533_s10 }
  0x22   : > { %p1536_p1 = scmp.lt.s32.totalorder %s1534_s11, %s1528_s8 }
  0x24   : > { %p1537_p2 = por %p1536_p1, %p1535_p0 }
  0x25   : > { %1428 = vmatmul.mubr.msk.bf16.gmra.mrb[4].mxu0 %vm350_vm1, %v1515_v7 }
  0x26   : > { %1431 = vmatprep.mubr.msk.bf16.mxu0 %vm350_vm1, %v1516_v11  ;;  %1444 = vmatmul.mubr.msk.bf16.gmra.mrb[4].mxu1 %vm350_vm1, %v1523_v12  ;;  %v1849_v11 = vadd.s32 %v1756_v23, %v774_v56  ;;  %p1538_p3 = pnand %p1537_p2, %p1531_p13 }
  0x27   : > { %1447 = vmatprep.mubr.msk.bf16.mxu1 %vm350_vm1, %v1524_v13 }
  0x28   : > { %vm839_vm15 = vcmp.lt.s32.totalorder %v1849_v11, 512 }
  0x2d   : > { %1432 = vmatmul.mubr.msk.bf16.gmra.mrb[8].mxu0 %vm350_vm1, %v1517_v14 }
  0x2e   : > { %1435 = vmatprep.mubr.msk.bf16.mxu0 %vm350_vm1, %v1518_v15  ;;  %1448 = vmatmul.mubr.msk.bf16.gmra.mrb[8].mxu1 %vm350_vm1, %v1525_v16  ;;  %v1853_v15 = vadd.s32 %v1756_v23, %v777_v60  ;;  %v1856_v16 = vadd.s32 %v1756_v23, %v775_v61 }
  0x2f   : > { %1451 = vmatprep.mubr.msk.bf16.mxu1 %vm350_vm1, %v1526_v17 }
  0x35   : > { %1436 = vmatmul.mubr.msk.bf16.gmra.mrb[12].mxu0 %vm350_vm1, %v1519_v18 }
  0x36   : > { %1452 = vmatmul.mubr.msk.bf16.gmra.mrb[12].mxu1 %vm350_vm1, %v1527_v19  ;;  %vm836_vm1 = vcmp.lt.s32.totalorder %v1843_v8, 512 }
  0xf0   : > { %v1425_v47 = vpop.f32.mrb[0].mxu0 }
  0xf1   : > { %v446_v52 = vadd.f32 %v1425_v47, %v1784_v39  ;;  %v437_v53 = vpop.f32.mrb[1].mxu0  ;;  %v1441_v9 = vpop.f32.mrb[0].mxu1 }
  0xf2   : > { %v438_v57 = vadd.f32 %v1784_v39, %v437_v53  ;;  %v1426_v58 = vpop.f32.mrb[2].mxu0  ;;  %v501_v14 = vpop.f32.mrb[1].mxu1  ;;  %v1886_v46 = vadd.f32 %v1441_v9, %v1784_v39 }
  0xf3   : > { %v566_v62 = vmax.f32 %v446_v52, 0.0  ;;  %v449_v63 = vadd.f32 %v1426_v58, %v1784_v39  ;;  %v440_v0 = vpop.f32.mrb[3].mxu0  ;;  %v1442_v19 = vpop.f32.mrb[2].mxu1  ;;  %v1891_v55 = vadd.f32 %v1784_v39, %v501_v14 }
  0xf4   : > { %v564_v3 = vmax.f32 %v438_v57, 0.0  ;;  %v441_v4 = vadd.f32 %v1784_v39, %v440_v0  ;;  %v504_v29 = vpop.f32.mrb[3].mxu1  ;;  %v1895_v58 = vadd.f32 %v1442_v19, %v1784_v39 }
  0xf5   : > { %v567_v7 = vmax.f32 %v449_v63, 0.0  ;;  %v921_v17 = vsel %vm825_vm2, %v566_v62, 0.0  ;;  %v1905_v5 = vadd.f32 %v1784_v39, %v504_v29  ;;  %vm838_vm2 = vcmp.lt.s32.totalorder %v1834_v1, 512 }
  0xf6   : > { %v919_v12 = vsel %vm823_vm3, %v564_v3, 0.0  ;;  %v565_v13 = vmax.f32 %v441_v4, 0.0  ;;  %v990_v36 = vmul.f32 %v921_v17, %v921_v17  ;;  %v582_v4 = vmax.f32 %v1886_v46, 0.0 }
  0xf7   : > { %v1311_v18 = vpack.c.bf16 %v567_v7, %v566_v62  ;;  %v988_v32 = vmul.f32 %v919_v12, %v919_v12  ;;  %v922_v37 = vsel %vm826_vm5, %v567_v7, 0.0  ;;  %vm840_vm3 = vcmp.lt.s32.totalorder %v1856_v16, 512 }
  0xf8   : > { %v1306_v24 = vpack.c.bf16 %v565_v13, %v564_v3  ;;  %v920_v25 = vsel %vm824_vm4, %v565_v13, 0.0  ;;  %v1429_v27 = vpop.f32.mrb[4].mxu0  ;;  %v991_v60 = vmul.f32 %v922_v37, %v922_v37  ;;  %vm841_vm4 = vcmp.lt.s32.totalorder %v1846_v10, 512 }
  0xf9   : > { %1383 = vst [vmem:[%s1877_s27 + $0x8] sm:$0xff] %v1311_v18   ;;  %v951_v33 = vadd.f32 %v920_v25, %v919_v12  ;;  %v989_v34 = vmul.f32 %v920_v25, %v920_v25  ;;  %v462_v28 = vadd.f32 %v1429_v27, %v1784_v39  ;;  %v453_v35 = vpop.f32.mrb[5].mxu0  ;;  %v1899_v0 = vpop.f32.mrb[4].mxu1  ;;  %vm842_vm5 = vcmp.lt.s32.totalorder %v1853_v15, 512 }
  0xfa   : > { %1307 = vst [vmem:[%s1877_s27] sm:$0xff] %v1306_v24   ;;  %v454_v38 = vadd.f32 %v1784_v39, %v453_v35  ;;  %v1430_v42 = vpop.f32.mrb[6].mxu0  ;;  %v1907_v6 = vpop.f32.mrb[5].mxu1  ;;  %v583_v24 = vmax.f32 %v1895_v58, 0.0 }
  0xfb   : > { %v952_v47 = vadd.f32 %v951_v33, %v921_v17  ;;  %v1020_v52 = vadd.f32 %v989_v34, %v988_v32  ;;  %v465_v53 = vadd.f32 %v1430_v42, %v1784_v39  ;;  %v456_v54 = vpop.f32.mrb[7].mxu0  ;;  %v570_v56 = vmax.f32 %v462_v28, 0.0  ;;  %v1910_v14 = vpop.f32.mrb[6].mxu1 }
  0xfc   : > { %v568_v31 = vmax.f32 %v454_v38, 0.0  ;;  %v457_v57 = vadd.f32 %v1784_v39, %v456_v54  ;;  %v1917_v25 = vpop.f32.mrb[7].mxu1  ;;  %v580_v34 = vmax.f32 %v1891_v55, 0.0  ;;  %v2010_v51 = vadd.f32 %v1910_v14, %v1784_v39 }
  0xfd   : > { %v1021_v61 = vadd.f32 %v1020_v52, %v990_v36  ;;  %v953_v62 = vadd.f32 %v952_v47, %v922_v37  ;;  %v571_v63 = vmax.f32 %v465_v53, 0.0  ;;  %v925_v41 = vsel %vm829_vm7, %v570_v56, 0.0 }
  0xfe   : > { %v923_v2 = vsel %vm827_vm6, %v568_v31, 0.0  ;;  %v569_v3 = vmax.f32 %v457_v57, 0.0  ;;  %v1351_v36 = vpack.c.bf16 %v583_v24, %v582_v4  ;;  %v994_v37 = vmul.f32 %v925_v41, %v925_v41 }
  0xff   : > { %v954_v7 = vadd.f32 %v953_v62, %v923_v2  ;;  %v992_v9 = vmul.f32 %v923_v2, %v923_v2  ;;  %v1022_v12 = vadd.f32 %v1021_v61, %v991_v60  ;;  %v1321_v13 = vpack.c.bf16 %v571_v63, %v570_v56 }
 0x100   : > { %v1316_v17 = vpack.c.bf16 %v569_v3, %v568_v31  ;;  %v924_v18 = vsel %vm828_vm8, %v569_v3, 0.0  ;;  %v1433_v19 = vpop.f32.mrb[8].mxu0  ;;  %v926_v40 = vsel %vm830_vm9, %v571_v63, 0.0  ;;  %1391 = vst [vmem:[%s1877_s27 + $0x48] sm:$0xff] %v1351_v36   ;;  %v581_v56 = vmax.f32 %v1905_v5, 0.0 }
 0x101   : > { %v1023_v27 = vadd.f32 %v1022_v12, %v992_v9  ;;  %1385 = vst [vmem:[%s1877_s27 + $0x18] sm:$0xff] %v1321_v13   ;;  %v955_v29 = vadd.f32 %v954_v7, %v924_v18  ;;  %v993_v32 = vmul.f32 %v924_v18, %v924_v18  ;;  %v469_v33 = vpop.f32.mrb[9].mxu0  ;;  %v478_v44 = vadd.f32 %v1433_v19, %v1784_v39  ;;  %v1938_v62 = vpop.f32.mrb[8].mxu1 }
 0x102   : > { %1384 = vst [vmem:[%s1877_s27 + $0x10] sm:$0xff] %v1316_v17   ;;  %v470_v28 = vadd.f32 %v1784_v39, %v469_v33  ;;  %v1434_v35 = vpop.f32.mrb[10].mxu0  ;;  %v995_v31 = vmul.f32 %v926_v40, %v926_v40  ;;  %v1346_v3 = vpack.c.bf16 %v581_v56, %v580_v34  ;;  %v1949_v7 = vadd.s32 %v1756_v23, %v1865_v22  ;;  %v1951_v9 = vpop.f32.mrb[9].mxu1 }
 0x103   : > { %v956_v38 = vadd.f32 %v955_v29, %v925_v41  ;;  %v1024_v42 = vadd.f32 %v1023_v27, %v993_v32  ;;  %v481_v47 = vadd.f32 %v1434_v35, %v1784_v39  ;;  %v472_v52 = vpop.f32.mrb[11].mxu0  ;;  %v574_v43 = vmax.f32 %v478_v44, 0.0  ;;  %v1956_v17 = vpop.f32.mrb[10].mxu1 }
 0x104   : > { %v572_v53 = vmax.f32 %v470_v28, 0.0  ;;  %v473_v54 = vadd.f32 %v1784_v39, %v472_v52  ;;  %v1954_v41 = vadd.s32 208, %v1752_v21  ;;  %1390 = vst [vmem:[%s1877_s27 + $0x40] sm:$0xff] %v1346_v3   ;;  %v1963_v32 = vpop.f32.mrb[11].mxu1  ;;  %v1966_v35 = vadd.s32 192, %v1752_v21 }
 0x105   : > { %v1025_v57 = vadd.f32 %v1024_v42, %v994_v37  ;;  %v957_v60 = vadd.f32 %v956_v38, %v926_v40  ;;  %v575_v61 = vmax.f32 %v481_v47, 0.0  ;;  %v929_v18 = vsel %vm833_vm11, %v574_v43, 0.0 }
 0x106   : > { %v927_v63 = vsel %vm831_vm10, %v572_v53, 0.0  ;;  %v573_v2 = vmax.f32 %v473_v54, 0.0  ;;  %v1976_v38 = vadd.f32 %v1899_v0, %v1784_v39  ;;  %v998_v42 = vmul.f32 %v929_v18, %v929_v18 }
 0x107   : > { %v958_v12 = vadd.f32 %v957_v60, %v927_v63  ;;  %v996_v13 = vmul.f32 %v927_v63, %v927_v63  ;;  %v1026_v48 = vadd.f32 %v1025_v57, %v995_v31  ;;  %v1331_v19 = vpack.c.bf16 %v575_v61, %v574_v43 }
 0x108   : > { %v1326_v27 = vpack.c.bf16 %v573_v2, %v572_v53  ;;  %v928_v22 = vsel %vm832_vm12, %v573_v2, 0.0  ;;  %v1437_v29 = vpop.f32.mrb[12].mxu0  ;;  %v930_v45 = vsel %vm834_vm13, %v575_v61, 0.0  ;;  %v1982_v57 = vadd.s32 216, %v1752_v21 }
 0x109   : > { %v1027_v33 = vadd.f32 %v1026_v48, %v996_v13  ;;  %v959_v40 = vadd.f32 %v958_v12, %v928_v22  ;;  %v997_v44 = vmul.f32 %v928_v22, %v928_v22  ;;  %v485_v28 = vpop.f32.mrb[13].mxu0  ;;  %1387 = vst [vmem:[%s1877_s27 + $0x28] sm:$0xff] %v1331_v19   ;;  %v494_v36 = vadd.f32 %v1437_v29, %v1784_v39  ;;  %v1985_v2 = vpop.f32.mrb[12].mxu1 }
 0x10a   : > { %1386 = vst [vmem:[%s1877_s27 + $0x20] sm:$0xff] %v1326_v27   ;;  %v486_v50 = vadd.f32 %v1784_v39, %v485_v28  ;;  %v1438_v37 = vpop.f32.mrb[14].mxu0  ;;  %v999_v60 = vmul.f32 %v930_v45, %v930_v45  ;;  %v935_v13 = vsel %vm839_vm15, %v580_v34, 0.0  ;;  %v518_v48 = vadd.f32 %v1784_v39, %v1907_v6 }
 0x10b   : > { %v960_v47 = vadd.f32 %v959_v40, %v929_v18  ;;  %v1028_v52 = vadd.f32 %v1027_v33, %v997_v44  ;;  %v497_v43 = vadd.f32 %v1438_v37, %v1784_v39  ;;  %v488_v53 = vpop.f32.mrb[15].mxu0  ;;  %v578_v49 = vmax.f32 %v494_v36, 0.0  ;;  %v549_v18 = vpop.f32.mrb[13].mxu1 }
 0x10c   : > { %v576_v54 = vmax.f32 %v486_v50, 0.0  ;;  %v489_v31 = vadd.f32 %v1784_v39, %v488_v53  ;;  %v586_v59 = vmax.f32 %v1976_v38, 0.0  ;;  %vm843_vm6 = vcmp.lt.s32.totalorder %v1870_v30, 512  ;;  %v1454_v29 = vpop.f32.mrb[14].mxu1 }
 0x10d   : > { %v1029_v61 = vadd.f32 %v1028_v52, %v998_v42  ;;  %v961_v63 = vadd.f32 %v960_v47, %v930_v45  ;;  %v579_v0 = vmax.f32 %v497_v43, 0.0  ;;  %v933_v11 = vsel %vm837_vm0, %v578_v49, 0.0  ;;  %v2002_v6 = vpop.f32.mrb[15].mxu1 }
 0x10e   : > { %v931_v3 = vsel %vm835_vm14, %v576_v54, 0.0  ;;  %v577_v12 = vmax.f32 %v489_v31, 0.0  ;;  %v584_v36 = vmax.f32 %v518_v48, 0.0  ;;  %v521_v50 = vadd.f32 %v1784_v39, %v1917_v25 }
 0x10f   : > { %v962_v19 = vadd.f32 %v961_v63, %v931_v3  ;;  %v1000_v27 = vmul.f32 %v931_v3, %v931_v3  ;;  %v1030_v22 = vadd.f32 %v1029_v61, %v999_v60  ;;  %v1341_v55 = vpack.c.bf16 %v579_v0, %v578_v49 }
 0x110   : > { %v1336_v34 = vpack.c.bf16 %v577_v12, %v576_v54  ;;  %v932_v33 = vsel %vm836_vm1, %v577_v12, 0.0  ;;  %v934_v44 = vsel %vm838_vm2, %v579_v0, 0.0  ;;  %v2016_v8 = vadd.f32 %v1938_v62, %v1784_v39 }
 0x111   : > { %v1031_v40 = vadd.f32 %v1030_v22, %v1000_v27  ;;  %v963_v28 = vadd.f32 %v962_v19, %v932_v33  ;;  %v1001_v45 = vmul.f32 %v932_v33, %v932_v33  ;;  %1389 = vst [vmem:[%s1877_s27 + $0x38] sm:$0xff] %v1341_v55   ;;  %v1002_v37 = vmul.f32 %v933_v11, %v933_v11 }
 0x112   : > { %1388 = vst [vmem:[%s1877_s27 + $0x30] sm:$0xff] %v1336_v34   ;;  %vm844_vm7 = vcmp.lt.s32.totalorder %v1949_v7, 512  ;;  %v783_v47 = vadd.s32 200, %v1752_v21  ;;  %v587_v52 = vmax.f32 %v2010_v51, 0.0  ;;  %v585_v43 = vmax.f32 %v521_v50, 0.0 }
 0x113   : > { %v964_v42 = vadd.f32 %v963_v28, %v933_v11  ;;  %v1032_v1 = vadd.f32 %v1031_v40, %v1001_v45  ;;  %v2023_v14 = vadd.f32 %v1784_v39, %v1951_v9  ;;  %v2027_v25 = vadd.f32 %v1956_v17, %v1784_v39 }
 0x114   : > { %v1003_v62 = vmul.f32 %v934_v44, %v934_v44  ;;  %v1004_v54 = vmul.f32 %v935_v13, %v935_v13  ;;  %vm845_vm8 = vcmp.lt.s32.totalorder %v1862_v20, 512  ;;  %v936_v31 = vsel %vm840_vm3, %v581_v56, 0.0 }
 0x115   : > { %v1033_v53 = vadd.f32 %v1032_v1, %v1002_v37  ;;  %v965_v49 = vadd.f32 %v964_v42, %v934_v44  ;;  %v1361_v9 = vpack.c.bf16 %v587_v52, %v586_v59  ;;  %v1356_v17 = vpack.c.bf16 %v585_v43, %v584_v36 }
 0x116   : > { %v590_v60 = vmax.f32 %v2016_v8, 0.0  ;;  %vm846_vm9 = vcmp.lt.s32.totalorder %v1873_v26, 512  ;;  %v2042_v0 = vadd.s32 %v1756_v23, %v1954_v41  ;;  %v815_v16 = vadd.s32 %v1756_v23, %v1966_v35 }
 0x117   : > { %v966_v61 = vadd.f32 %v965_v49, %v935_v13  ;;  %v1034_v63 = vadd.f32 %v1033_v53, %v1003_v62  ;;  %v937_v5 = vsel %vm841_vm4, %v582_v4, 0.0  ;;  %1393 = vst [vmem:[%s1877_s27 + $0x58] sm:$0xff] %v1361_v9   ;;  %1392 = vst [vmem:[%s1877_s27 + $0x50] sm:$0xff] %v1356_v17   ;;  %v588_v56 = vmax.f32 %v2023_v14, 0.0 }
 0x118   : > { %v591_v3 = vmax.f32 %v2027_v25, 0.0  ;;  %v2056_v12 = vadd.f32 %v1784_v39, %v1963_v32  ;;  %v938_v46 = vsel %vm842_vm5, %v583_v24, 0.0  ;;  %v1005_v10 = vmul.f32 %v936_v31, %v936_v31 }
 0x119   : > { %v1035_v41 = vadd.f32 %v1034_v63, %v1004_v54  ;;  %v967_v35 = vadd.f32 %v966_v61, %v936_v31  ;;  %v939_v4 = vsel %vm843_vm6, %v584_v36, 0.0  ;;  %v2071_v32 = vadd.f32 %v1985_v2, %v1784_v39 }
 0x11a   : > { %v1371_v13 = vpack.c.bf16 %v591_v3, %v590_v60  ;;  %v589_v48 = vmax.f32 %v2056_v12, 0.0  ;;  %v1006_v58 = vmul.f32 %v937_v5, %v937_v5  ;;  %v2074_v19 = vadd.f32 %v1784_v39, %v549_v18 }
 0x11b   : > { %v968_v15 = vadd.f32 %v967_v35, %v937_v5  ;;  %v1036_v24 = vadd.f32 %v1035_v41, %v1005_v10  ;;  %v2080_v27 = vadd.s32 %v1756_v23, %v783_v47  ;;  %v594_v22 = vmax.f32 %v2071_v32, 0.0 }
 0x11c   : > { %1395 = vst [vmem:[%s1877_s27 + $0x68] sm:$0xff] %v1371_v13   ;;  %v1366_v30 = vpack.c.bf16 %v589_v48, %v588_v56  ;;  %v2084_v2 = vadd.f32 %v1454_v29, %v1784_v39  ;;  %v1007_v11 = vmul.f32 %v938_v46, %v938_v46  ;;  %v1008_v33 = vmul.f32 %v939_v4, %v939_v4 }
 0x11d   : > { %v1037_v55 = vadd.f32 %v1036_v24, %v1006_v58  ;;  %v969_v34 = vadd.f32 %v968_v15, %v938_v46  ;;  %v940_v18 = vsel %vm844_vm7, %v585_v43, 0.0  ;;  %v592_v40 = vmax.f32 %v2074_v19, 0.0 }
 0x11e   : > { %1394 = vst [vmem:[%s1877_s27 + $0x60] sm:$0xff] %v1366_v30   ;;  %v595_v44 = vmax.f32 %v2084_v2, 0.0  ;;  %v2093_v28 = vadd.f32 %v1784_v39, %v2002_v6  ;;  %vm847_vm10 = vcmp.lt.s32.totalorder %v815_v16, 512  ;;  %v786_v36 = vadd.s32 224, %v1752_v21 }
 0x11f   : > { %v970_v29 = vadd.f32 %v969_v34, %v939_v4  ;;  %v1038_v45 = vadd.f32 %v1037_v55, %v1007_v11  ;;  %v941_v7 = vsel %vm845_vm8, %v586_v59, 0.0  ;;  %v2104_v50 = vadd.s32 %v1756_v23, %v1982_v57 }
 0x120   : > { %v1381_v39 = vpack.c.bf16 %v595_v44, %v594_v22  ;;  %v593_v6 = vmax.f32 %v2093_v28, 0.0  ;;  %v1009_v1 = vmul.f32 %v940_v18, %v940_v18  ;;  %vm848_vm11 = vcmp.lt.s32.totalorder %v2080_v27, 512 }
 0x121   : > { %v1039_v37 = vadd.f32 %v1038_v45, %v1008_v33  ;;  %v971_v42 = vadd.f32 %v970_v29, %v940_v18  ;;  %v942_v20 = vsel %vm846_vm9, %v587_v52, 0.0  ;;  %v943_v38 = vsel %vm847_vm10, %v588_v56, 0.0 }
 0x122   : > { %1397 = vst [vmem:[%s1877_s27 + $0x78] sm:$0xff] %v1381_v39   ;;  %v1376_v57 = vpack.c.bf16 %v593_v6, %v592_v40  ;;  %v787_v59 = vadd.s32 232, %v1752_v21  ;;  %v1010_v47 = vmul.f32 %v941_v7, %v941_v7  ;;  %v819_v51 = vadd.s32 %v1756_v23, %v786_v36 }
 0x123   : > { %v972_v43 = vadd.f32 %v971_v42, %v941_v7  ;;  %v1040_v14 = vadd.f32 %v1039_v37, %v1009_v1  ;;  %vm849_vm12 = vcmp.lt.s32.totalorder %v2042_v0, 512  ;;  %v788_v26 = vadd.s32 240, %v1752_v21 }
 0x124   : > { %1396 = vst [vmem:[%s1877_s27 + $0x70] sm:$0xff] %v1376_v57   ;;  %v1011_v52 = vmul.f32 %v942_v20, %v942_v20  ;;  %v1012_v49 = vmul.f32 %v943_v38, %v943_v38 }
 0x125   : > { %v1041_v62 = vadd.f32 %v1040_v14, %v1010_v47  ;;  %v973_v53 = vadd.f32 %v972_v43, %v942_v20 }
 0x126   : > { %1541 = shalt.err (!%p1538_p3)
}
 0x127   : > { %s1542_s12 = scalar_lea.hbm %s2115_s6, 2048  ;;  %s1546_s20 = scalar_lea.hbm %s2231_s3, 4096 }
 0x128   : > { %p1543_p4 = scmp.ne.s32.totalorder %s2115_s6, %s1542_s12  ;;  %p1547_p9 = scmp.lt.u32.totalorder %s2115_s6, %s2231_s3 }
 0x129   : > { %p1548_p10 = scmp.lt.u32.totalorder %s1546_s20, %s1542_s12  ;;  %p1550_p12 = scmp.lt.u32.totalorder %s1542_s12, %s2115_s6 }
 0x12a   : > { %p1544_p7 = pnand %p1543_p4, %p1691_p5 }
 0x12b   : > { %p1549_p11 = por %p1548_p10, %p1547_p9 }
 0x12c   : > { %p1545_p8 = pneg %p1544_p7 }
 0x12d   : > { %p1551_p13 = por %p1550_p12, %p1549_p11 }
 0x12f   : > { %p1552_p0 = pnand %p1551_p13, %p1545_p8 }
 0x131   : > { %1555 = shalt.err (!%p1552_p0)
}
 0x132   : > { %s1625_s28 = smov 64   ;;  %s1626_s19 = smov 4   ;;  %vm850_vm13 = vcmp.lt.s32.totalorder %v2104_v50, 512  ;;  %v944_v54 = vsel %vm848_vm11, %v589_v48, 0.0  ;;  %v789_v31 = vadd.s32 248, %v1752_v21  ;;  %v974_v9 = vadd.f32 %v973_v53, %v943_v38 }
 0x133   : > { %1463 = dma.vmem_to_hbm [thread:$0]  (%p1691_p5), %s2117_s29, 2048, %s2115_s6, %s1061_s7, %s1625_s28, %s1625_s28, %s1626_s19   ;;  %v1042_v17 = vadd.f32 %v1041_v62, %v1011_v52  ;;  %vm851_vm14 = vcmp.lt.s32.totalorder %v819_v51, 512  ;;  %v820_v61 = vadd.s32 %v1756_v23, %v787_v59  ;;  %v945_v63 = vsel %vm849_vm12, %v590_v60, 0.0 }
 0x134   : > { %v821_v16 = vadd.s32 %v1756_v23, %v788_v26  ;;  %v975_v56 = vadd.f32 %v974_v9, %v944_v54  ;;  %v1013_v12 = vmul.f32 %v944_v54, %v944_v54  ;;  %v946_v41 = vsel %vm850_vm13, %v591_v3, 0.0  ;;  %s1191_s29 = sshll.u32 %s1806_s22, 1  ;;  %s2185_s9 = scalar_lea.hbm %s2232_s4, %s1708_s5 }
 0x135   : > { %v1043_v5 = vadd.f32 %v1042_v17, %v1012_v49  ;;  %v947_v21 = vsel %vm851_vm14, %v592_v40, 0.0  ;;  %v822_v46 = vadd.s32 %v1756_v23, %v789_v31  ;;  %v1014_v35 = vmul.f32 %v945_v63, %v945_v63  ;;  %s202_s30 = scalar_lea.vmem [#allocation4], %s1191_s29  ;;  %s1066_s10 = scalar_lea.sflag [#allocation5], %s1806_s22 }
 0x136   : > { %v976_v10 = vadd.f32 %v975_v56, %v945_v63  ;;  %vm852_vm15 = vcmp.lt.s32.totalorder %v820_v61, 512  ;;  %vm853_vm0 = vcmp.lt.s32.totalorder %v821_v16, 512  ;;  %v1015_v8 = vmul.f32 %v946_v41, %v946_v41  ;;  %s1095_s6 = sshll.u32 %s202_s30, 4  ;;  %s1627_s12 = smov [#allocation4]   ;;  %s2187_s6 = int_to_ptr.vmem [resolvable:$true] %s1095_s6 }
 0x137   : > { %v1044_v4 = vadd.f32 %v1043_v5, %v1013_v12  ;;  %v1016_v13 = vmul.f32 %v947_v21, %v947_v21  ;;  %v948_v48 = vsel %vm852_vm15, %v593_v6, 0.0  ;;  %vm854_vm1 = vcmp.lt.s32.totalorder %v822_v46, 512  ;;  %s1556_s11 = scalar_lea.vmem %s2187_s6, 32  ;;  %s1560_s13 = sshll.u32 %s1627_s12, 4  ;;  %s1561_s13 = int_to_ptr.vmem [resolvable:$false] %s1560_s13 }
 0x138   : > { %v977_v0 = vadd.f32 %v976_v10, %v946_v41  ;;  %v949_v3 = vsel %vm853_vm0, %v594_v22, 0.0  ;;  %v1017_v24 = vmul.f32 %v948_v48, %v948_v48  ;;  %v950_v19 = vsel %vm854_vm1, %v595_v44, 0.0  ;;  %p1557_p1 = scmp.ne.s32.totalorder %s2187_s6, %s1556_s11  ;;  %s1562_s14 = scalar_lea.vmem %s1561_s13, 64 }
 0x139   : > { %v1045_v60 = vadd.f32 %v1044_v4, %v1014_v35  ;;  %v1018_v30 = vmul.f32 %v949_v3, %v949_v3  ;;  %v1019_v55 = vmul.f32 %v950_v19, %v950_v19  ;;  %vm1057_vm2 = vcmask 1040384   ;;  %p1563_p4 = scmp.lt.s32.totalorder %s2187_s6, %s1561_s13  ;;  %p1564_p7 = scmp.lt.s32.totalorder %s1562_s14, %s1556_s11 }
 0x13a   : > { %v978_v58 = vadd.f32 %v977_v0, %v947_v21  ;;  %p1558_p2 = pnand %p1557_p1, %p1691_p5 }
 0x13b   : > { %v1046_v25 = vadd.f32 %v1045_v60, %v1015_v8  ;;  %p1565_p8 = por %p1564_p7, %p1563_p4 }
 0x13c   : > { %v979_v23 = vadd.f32 %v978_v58, %v948_v48  ;;  %p1559_p3 = pneg %p1558_p2 }
 0x13d   : > { %v1047_v15 = vadd.f32 %v1046_v25, %v1016_v13 }
 0x13e   : > { %v980_v27 = vadd.f32 %v979_v23, %v949_v3  ;;  %p1566_p9 = pnand %p1565_p8, %p1559_p3 }
 0x13f   : > { %v1048_v11 = vadd.f32 %v1047_v15, %v1017_v24 }
 0x140   : > { %v981_v34 = vadd.f32 %v980_v27, %v950_v19 }
 0x141   : > { %v1049_v33 = vadd.f32 %v1048_v11, %v1018_v30 }
 0x142   : > { %v982_v18 = vrot.slane %v981_v34, 4 }
 0x143   : > { %v1050_v40 = vadd.f32 %v1049_v33, %v1019_v55 }
 0x144   : > { %v983_v28 = vadd.f32 %v982_v18, %v981_v34 }
 0x145   : > { %v1051_v29 = vrot.slane %v1050_v40, 4 }
 0x146   : > { %v984_v32 = vrot.slane %v983_v28, 2 }
 0x147   : > { %v1052_v22 = vadd.f32 %v1051_v29, %v1050_v40 }
 0x148   : > { %v985_v45 = vadd.f32 %v984_v32, %v983_v28 }
 0x149   : > { %v1053_v36 = vrot.slane %v1052_v22, 2 }
 0x14a   : > { %v986_v2 = vrot.slane %v985_v45, 1 }
 0x14b   : > { %v1054_v44 = vadd.f32 %v1053_v36, %v1052_v22 }
 0x14c   : > { %v987_v50 = vadd.f32 %v986_v2, %v985_v45 }
 0x14d   : > { %v1055_v7 = vrot.slane %v1054_v44, 1 }
 0x14f   : > { %v1056_v39 = vadd.f32 %v1055_v7, %v1054_v44 }
 0x151   : > { %v1058_v6 = vsel %vm1057_vm2, %v987_v50, %v1056_v39 }
 0x152   : > { %1059 = vst [vmem:[%s202_s30] sm:$0x3] %v1058_v6 }
 0x153   : > { %1569 = shalt.err (!%p1566_p9)
}
 0x154   : > { %s1570_s5 = scalar_lea.hbm %s2185_s9, 32  ;;  %s1574_s23 = scalar_lea.hbm %s2232_s4, 64 }
 0x155   : > { %p1571_p10 = scmp.ne.s32.totalorder %s2185_s9, %s1570_s5  ;;  %p1575_p13 = scmp.lt.u32.totalorder %s2185_s9, %s2232_s4 }
 0x156   : > { %p1576_p0 = scmp.lt.u32.totalorder %s1574_s23, %s1570_s5  ;;  %p1578_p2 = scmp.lt.u32.totalorder %s1570_s5, %s2185_s9 }
 0x157   : > { %p1572_p11 = pnand %p1571_p10, %p1691_p5 }
 0x158   : > { %p1577_p1 = por %p1576_p0, %p1575_p13 }
 0x159   : > { %p1573_p12 = pneg %p1572_p11 }
 0x15a   : > { %p1579_p3 = por %p1578_p2, %p1577_p1 }
 0x15c   : > { %p1580_p4 = pnand %p1579_p3, %p1573_p12 }
 0x15e   : > { %1583 = shalt.err (!%p1580_p4)
}
 0x15f   : > { %1464 = dma.vmem_to_hbm [thread:$0]  (%p1691_p5), %s2187_s6, 32, %s2185_s9, %s1066_s10  }
 0x160 PF: > { %p1474_p7 = scmp.ge.s32.totalorder %s1622_s18, 2  ;;  %s1107_s19 = sand.u32 1, %s1610_s15  }
 0x161   : > { %s1108_s29 = scalar_lea.sflag [#allocation3], %s1107_s19 }
 0x162   : > { %p1468_p8 = pnand %p1474_p7, %p1695_p6 }
 0x164   : > { %1601 = dma.done.wait (!%p1468_p8), %s1108_s29, 2048  }
 0x165   : > { %1603 = vsyncadd (!%p1468_p8), %s1108_s29, 4294965248  ;;  %s1117_s30 = scalar_lea.sflag [#allocation5], %s1107_s19 }
 0x166   : > { %1605 = dma.done.wait (!%p1468_p8), %s1117_s30, 32  }
 0x167   : > { %1607 = vsyncadd (!%p1468_p8), %s1117_s30, 4294967264  ;;  %p18_p5 = scmp.ge.s32.totalorder %s1678_s21, 4   ;;  %s2235_s15 = smov %s1614_s16 }
 0x168   : > { %s2236_s16 = smov %s1618_s17  ;;  %s2237_s17 = smov %s1689_s24 }
 0x169   : > { %s2238_s18 = smov %s1678_s21  ;;  %20 = sbr.rel (!%p18_p5) target bundleno = 5 (0x5), region = 84 }
 0x170   :  { %1122 = vsyncpa [#allocation3], 1 }
 0x171   :  { %1124 = vsyncpa [#allocation3 + $0x1], 1 }
 0x172   :  { %1125 = vsyncpa [#allocation5], 1 }
 0x173   :  { %1127 = vsyncpa [#allocation5 + $0x1], 1 }

</bundles_post_ra>
